<compile_context>
chip_gen: v7x
topology: tpu7x:2x2x1
jax: 0.10.0
libtpu: 0.0.40
codegen_flags: <defaults>
</compile_context>

<pallas_src>
import functools
import math

import jax
import jax.numpy as jnp
from jax import lax
from jax.experimental import pallas as pl
from jax.experimental.pallas import tpu as pltpu


def _round_up(x: int, m: int) -> int:
    return ((x + m - 1) // m) * m


def _vmem_capacity_bytes() -> int:
    """Best-effort physical VMEM capacity; falls back to 128 MiB."""
    try:
        info = pltpu.get_tpu_info()
        cap = getattr(info, "vmem_capacity_bytes", None)
        if cap:
            return int(cap)
    except Exception:
        pass
    return 128 * 1024 * 1024


# ---------------------------------------------------------------------------
# Kernels
# ---------------------------------------------------------------------------
def _layer_norm_kernel(x_ref, g_ref, b_ref, o_ref, *, eps: float):
    """Plain path: one (block_rows, H) tile; H sits on lanes."""
    x = x_ref[...].astype(jnp.float32)
    mean = jnp.mean(x, axis=-1, keepdims=True)
    var = jnp.mean((x - mean) ** 2, axis=-1, keepdims=True)      # biased var
    inv = lax.rsqrt(var + eps)                                   # EUP rsqrt
    xhat = (x - mean) * inv
    if o_ref.dtype == jnp.float32:
        y = xhat * g_ref[...].astype(jnp.float32) + b_ref[...].astype(jnp.float32)
    else:
        # Narrow dtype: do the affine in the activation dtype (halves f32 temps;
        # bf16 VALUs on v6e/v7x). Stats stayed in f32 above.
        y = xhat.astype(o_ref.dtype) * g_ref[...] + b_ref[...]
    o_ref[...] = y.astype(o_ref.dtype)


def _layer_norm_packed_kernel(x_ref, m_ref, g_ref, b_ref, o_ref, *, eps: float):
    """Lane-dense path for H < 128: k = 128 // H logical rows per 128-lane row.

    m_ref is a (128, 128) block-diagonal averaging matrix with 1/H inside each
    H-wide segment; x @ M gives each lane its segment mean (segmented reduce +
    broadcast in a single MXU op, full f32 precision).
    """
    x = x_ref[...].astype(jnp.float32)
    M = m_ref[...]
    dn = (((1,), (0,)), ((), ()))
    mean = lax.dot_general(x, M, dn, precision=lax.Precision.HIGHEST,
                           preferred_element_type=jnp.float32)
    d = x - mean
    var = lax.dot_general(d * d, M, dn, precision=lax.Precision.HIGHEST,
                          preferred_element_type=jnp.float32)    # biased var
    inv = lax.rsqrt(var + eps)
    xhat = d * inv
    if o_ref.dtype == jnp.float32:
        y = xhat * g_ref[...].astype(jnp.float32) + b_ref[...].astype(jnp.float32)
    else:
        y = xhat.astype(o_ref.dtype) * g_ref[...] + b_ref[...]
    o_ref[...] = y.astype(o_ref.dtype)


# ---------------------------------------------------------------------------
# Wrapper
# ---------------------------------------------------------------------------
def layer_norm(x, weight=None, bias=None, *, normalized_shape=None,
               eps: float = 1e-5, block_rows: int | None = None):
    """Pallas LayerNorm over the trailing `normalized_shape` dims of x."""
    if normalized_shape is None or isinstance(normalized_shape, int):
        norm_ndims = 1
    else:
        norm_ndims = len(normalized_shape)

    orig_shape = x.shape
    H = math.prod(orig_shape[-norm_ndims:])
    lead = orig_shape[:-norm_ndims]
    R = math.prod(lead) if lead else 1

    dtype = x.dtype
    itemsize = jnp.dtype(dtype).itemsize

    g = jnp.ones((H,), dtype) if weight is None else weight.reshape(H).astype(dtype)
    b = jnp.zeros((H,), dtype) if bias is None else bias.reshape(H).astype(dtype)

    # ---- layout: fold leading dims onto sublanes, normalized dim on lanes ----
    k = 128 // H if (H < 128 and 128 % H == 0) else 1
    packed = k > 1 and (R % k == 0)
    if packed:
        Rl, Hl = R // k, 128
        x2 = x.reshape(Rl, Hl)                       # contiguous -> free reshape
        g2 = jnp.tile(g, k).reshape(1, Hl)
        b2 = jnp.tile(b, k).reshape(1, Hl)
        seg = jnp.arange(Hl, dtype=jnp.int32) // H
        M = jnp.where(seg[:, None] == seg[None, :], 1.0 / H, 0.0).astype(jnp.float32)
    else:
        Rl, Hl = R, H
        x2 = x.reshape(Rl, Hl)
        g2 = g.reshape(1, Hl)
        b2 = b.reshape(1, Hl)

    # ---- generation-aware row tiling -----------------------------------------
    vmem_cap = _vmem_capacity_bytes()
    is_small_vmem = vmem_cap <= (96 << 20)           # v7x-class (64 MiB VMEM)
    sub = 8 if itemsize >= 4 else (8 * 4) // itemsize    # sublane pack: 8/16/32
    row_bytes = Hl * itemsize
    # VMEM per row of block: 2x double-buffered in + 2x out + ~2 f32 temp rows.
    per_row_cost = 4 * row_bytes + 8 * Hl
    target_limit = (48 << 20) if is_small_vmem else (64 << 20)

    if block_rows is None:
        if Rl <= sub:
            block_rows = Rl                          # single full block
        else:
            budget_rows = max(sub, ((target_limit - (4 << 20)) // per_row_cost)
                              // sub * sub)
            per_buf_rows = max(sub, ((8 << 20) // max(row_bytes, 1)) // sub * sub)
            max_rows = min(budget_rows, per_buf_rows)
            # Aim for >= 4 blocks so the "parallel" axis shards across both
            # v7x TensorCores and the pipeline has something to overlap.
            rows_for_4 = _round_up(-(-Rl // 4), sub)
            block_rows = max(sub, min(max_rows, rows_for_4))

    num_blocks = pl.cdiv(Rl, block_rows)             # ragged last block is OK

    # vmem limit derived from the actual tiles (never more than ~90% physical).
    needed = block_rows * per_row_cost + (4 << 20)
    vmem_limit = int(min(max(needed, 32 << 20), int(vmem_cap * 0.9)))
    # TODO(synk): for pathologically large H (one 8-row tile > VMEM) an
    # H-blocked two-pass/Welford variant would be needed; not required for
    # transformer-sized hidden dims.

    in_specs = [pl.BlockSpec((block_rows, Hl), lambda i: (i, 0))]
    operands = [x2]
    if packed:
        in_specs.append(pl.BlockSpec((Hl, Hl), lambda i: (0, 0)))  # M: VMEM-resident
        operands.append(M)
    in_specs += [pl.BlockSpec((1, Hl), lambda i: (0, 0)),          # gamma
                 pl.BlockSpec((1, Hl), lambda i: (0, 0))]          # beta
    operands += [g2, b2]

    kernel = (functools.partial(_layer_norm_packed_kernel, eps=eps) if packed
              else functools.partial(_layer_norm_kernel, eps=eps))

    out = pl.pallas_call(
        kernel,
        out_shape=jax.ShapeDtypeStruct((Rl, Hl), dtype),
        grid=(num_blocks,),
        in_specs=in_specs,
        out_specs=pl.BlockSpec((block_rows, Hl), lambda i: (i, 0)),
        compiler_params=pltpu.CompilerParams(
            dimension_semantics=("parallel",),
            vmem_limit_bytes=vmem_limit,
        ),
    )(*operands)

    return out.reshape(orig_shape)


# ---------------------------------------------------------------------------
# Pure-JAX reference (mirrors the PyTorch forward semantics)
# ---------------------------------------------------------------------------
def layer_norm_ref(x, weight=None, bias=None, *, normalized_shape=None,
                   eps: float = 1e-5):
    if normalized_shape is None or isinstance(normalized_shape, int):
        norm_ndims = 1
    else:
        norm_ndims = len(normalized_shape)
    axes = tuple(range(x.ndim - norm_ndims, x.ndim))
    x32 = x.astype(jnp.float32)
    m = jnp.mean(x32, axis=axes, keepdims=True)
    v = jnp.mean((x32 - m) ** 2, axis=axes, keepdims=True)       # unbiased=False
    y = (x32 - m) / jnp.sqrt(v + eps)
    if weight is not None:
        y = y * weight.astype(jnp.float32)
    if bias is not None:
        y = y + bias.astype(jnp.float32)
    return y.astype(x.dtype)


# ---------------------------------------------------------------------------
# Main
# ---------------------------------------------------------------------------
if __name__ == "__main__":
    f32 = jnp.float32
    key = jax.random.PRNGKey(0)
    k0, k1, k2, k3 = jax.random.split(key, 4)

    # --- test 1: transformer-like shapes, H < 128 -> lane-dense packed path ---
    B, S, H = 2, 8, 32
    x = jax.random.normal(k0, (B, S, H), f32)
    weight = 1.0 + 0.1 * jax.random.normal(k1, (H,), f32)
    bias = 0.05 * jax.random.normal(k2, (H,), f32)

    out = layer_norm(x, weight, bias, normalized_shape=H, eps=1e-5)
    out = jax.block_until_ready(out)
    ref = layer_norm_ref(x, weight, bias, normalized_shape=H, eps=1e-5)
    assert out.shape == x.shape
    assert bool(jnp.all(jnp.isfinite(out)))
    assert bool(jnp.allclose(out, ref, atol=2e-5, rtol=2e-5))

    # --- test 2: H = 128, multi-block grid with a ragged (masked) last block ---
    B2, S2, H2 = 4, 100, 128                      # R = 400 rows, no padding copies
    x2 = jax.random.normal(k3, (B2, S2, H2), f32)
    w2 = jnp.ones((H2,), f32)
    b2 = jnp.zeros((H2,), f32)
    out2 = layer_norm(x2, w2, b2, normalized_shape=H2, eps=1e-5)
    out2 = jax.block_until_ready(out2)
    ref2 = layer_norm_ref(x2, w2, b2, normalized_shape=H2, eps=1e-5)
    assert out2.shape == x2.shape
    assert bool(jnp.allclose(out2, ref2, atol=1e-5, rtol=1e-5))

    print("KERNEL_OK")
</pallas_src>

<mosaic_0001>
module attributes {stable_mosaic.version = 11 : i64} {
  func.func @_layer_norm_packed_kernel(%arg0: i32, %arg1: memref<4x128xf32, #tpu.memory_space<vmem>>, %arg2: memref<128x128xf32, #tpu.memory_space<vmem>>, %arg3: memref<1x128xf32, #tpu.memory_space<vmem>>, %arg4: memref<1x128xf32, #tpu.memory_space<vmem>>, %arg5: memref<4x128xf32, #tpu.memory_space<vmem>>) attributes {dimension_semantics = [#tpu.dimension_semantics<parallel>], iteration_bounds = array<i64: 1>, scalar_prefetch = 0 : i64, scratch_operands = 0 : i64, tpu.core_type = #tpu.core_type<tc>, window_params = [{transform_indices = @transform_0, window_bounds = array<i64: 4, 128>}, {pipeline_mode = #tpu.pipeline_mode<synchronous>, transform_indices = @transform_1, window_bounds = array<i64: 128, 128>}, {pipeline_mode = #tpu.pipeline_mode<synchronous>, transform_indices = @transform_2, window_bounds = array<i64: 1, 128>}, {pipeline_mode = #tpu.pipeline_mode<synchronous>, transform_indices = @transform_3, window_bounds = array<i64: 1, 128>}, {transform_indices = @transform_4, window_bounds = array<i64: 4, 128>}]} {
    %c0 = arith.constant 0 : index
    %c0_0 = arith.constant 0 : index
    %0 = vector.load %arg1[%c0, %c0_0] : memref<4x128xf32, #tpu.memory_space<vmem>>, vector<4x128xf32>
    %c0_1 = arith.constant 0 : index
    %c0_2 = arith.constant 0 : index
    %1 = vector.load %arg2[%c0_1, %c0_2] : memref<128x128xf32, #tpu.memory_space<vmem>>, vector<128x128xf32>
    %cst = arith.constant dense<0.000000e+00> : vector<4x128xf32>
    %2 = tpu.matmul %0, %1, %cst {dimension_numbers = #tpu.dot_dimension_numbers<[1], [0], [0], [1], [0, 0, 1, 1], [], []>, precision = #tpu.contract_precision<fp32>} : vector<4x128xf32>, vector<128x128xf32>, vector<4x128xf32> -> vector<4x128xf32>
    %3 = arith.subf %0, %2 : vector<4x128xf32>
    %4 = arith.mulf %3, %3 : vector<4x128xf32>
    %cst_3 = arith.constant dense<0.000000e+00> : vector<4x128xf32>
    %5 = tpu.matmul %4, %1, %cst_3 {dimension_numbers = #tpu.dot_dimension_numbers<[1], [0], [0], [1], [0, 0, 1, 1], [], []>, precision = #tpu.contract_precision<fp32>} : vector<4x128xf32>, vector<128x128xf32>, vector<4x128xf32> -> vector<4x128xf32>
    %cst_4 = arith.constant 9.99999974E-6 : f32
    %6 = vector.broadcast %cst_4 : f32 to vector<4x128xf32>
    %7 = arith.addf %5, %6 : vector<4x128xf32>
    %8 = math.rsqrt %7 : vector<4x128xf32>
    %9 = arith.mulf %3, %8 : vector<4x128xf32>
    %c0_5 = arith.constant 0 : index
    %c0_6 = arith.constant 0 : index
    %10 = vector.load %arg3[%c0_5, %c0_6] : memref<1x128xf32, #tpu.memory_space<vmem>>, vector<1x128xf32>
    %11 = vector.broadcast %10 : vector<1x128xf32> to vector<4x128xf32>
    %12 = arith.mulf %9, %11 : vector<4x128xf32>
    %c0_7 = arith.constant 0 : index
    %c0_8 = arith.constant 0 : index
    %13 = vector.load %arg4[%c0_7, %c0_8] : memref<1x128xf32, #tpu.memory_space<vmem>>, vector<1x128xf32>
    %14 = vector.broadcast %13 : vector<1x128xf32> to vector<4x128xf32>
    %15 = arith.addf %12, %14 : vector<4x128xf32>
    %c0_9 = arith.constant 0 : index
    %c0_10 = arith.constant 0 : index
    %16 = vector.load %arg5[%c0_9, %c0_10] : memref<4x128xf32, #tpu.memory_space<vmem>>, vector<4x128xf32>
    tpu.vector_store %arg5[%c0_9, %c0_10], %15 {strides = array<i32>} : memref<4x128xf32, #tpu.memory_space<vmem>>, vector<4x128xf32>,
    return
  }
  func.func @transform_0(%arg0: i32) -> (i32, i32) {
    %c0_i32 = arith.constant 0 : i32
    %c0_i32_0 = arith.constant 0 : i32
    return %arg0, %c0_i32 : i32, i32
  }
  func.func @transform_1(%arg0: i32) -> (i32, i32) {
    %c0_i32 = arith.constant 0 : i32
    %c0_i32_0 = arith.constant 0 : i32
    %c0_i32_1 = arith.constant 0 : i32
    return %c0_i32, %c0_i32_0 : i32, i32
  }
  func.func @transform_2(%arg0: i32) -> (i32, i32) {
    %c0_i32 = arith.constant 0 : i32
    %c0_i32_0 = arith.constant 0 : i32
    %c0_i32_1 = arith.constant 0 : i32
    return %c0_i32, %c0_i32_0 : i32, i32
  }
  func.func @transform_3(%arg0: i32) -> (i32, i32) {
    %c0_i32 = arith.constant 0 : i32
    %c0_i32_0 = arith.constant 0 : i32
    %c0_i32_1 = arith.constant 0 : i32
    return %c0_i32, %c0_i32_0 : i32, i32
  }
  func.func @transform_4(%arg0: i32) -> (i32, i32) {
    %c0_i32 = arith.constant 0 : i32
    %c0_i32_0 = arith.constant 0 : i32
    return %arg0, %c0_i32 : i32, i32
  }
}

</mosaic_0001>

<bundles_post_ra>
// kernel: tpu_custom_call.1
= control target key start
LH: loop header
LB: loop body
LE: loop exit
PB: predicated region body
PF: predicated region fallthrough
CT: control target
= control target key end

     0   :  { %9 = vsyncpa [#allocation3], 0  ;;  %s2870_s0 = inlined_call_operand.hbm [shape: f32[4,128], index: 0, kind: input, shape index: {}]   ;;  %s2871_s1 = inlined_call_operand.hbm [shape: f32[128,128], index: 1, kind: input, shape index: {}]   ;;  %s2872_s2 = inlined_call_operand.vmem [shape: f32[1,128], index: 2, kind: input, shape index: {}]   ;;  %s2873_s3 = inlined_call_operand.vmem [shape: f32[1,128], index: 3, kind: input, shape index: {}]   ;;  %s2874_s4 = inlined_call_operand.hbm [shape: f32[4,128], index: 4, kind: output, shape index: {}]  }
   0x1   :  { %10 = vsyncpa [#allocation6], 0 }
   0x2   :  { %11 = vsyncpa [#allocation4], 0  ;;  %s2397_s15 = smov [#allocation2]   ;;  %s2398_s17 = smov [#allocation5]  }
   0x3   :  { %s18_s16 = sshll.u32 %s2397_s15, 4  ;;  %s27_s18 = sshll.u32 %s2398_s17, 4  ;;  %s19_s16 = int_to_ptr.vmem [resolvable:$true] %s18_s16  ;;  %s2430_s18 = int_to_ptr.vmem [resolvable:$true] %s27_s18 }
   0x4   :  { %s2325_s21 = scalar_lea.hbm %s2870_s0, 64 }
   0x5   :  { %p2326_p0 = scmp.ne.s32.totalorder %s2870_s0, %s2325_s21  ;;  %p2329_p1 = scmp.lt.u32.totalorder %s2325_s21, %s2870_s0 }
   0x7   :  { %p2331_p2 = pnand %p2329_p1, %p2326_p0 }
   0x9   :  { %2334 = shalt.err (!%p2331_p2)
}
   0xa   :  { %s2335_s26 = scalar_lea.vmem %s19_s16, 64  ;;  %p2340_p4 = scmp.lt.s32.totalorder %s19_s16, %s19_s16 }
   0xb   :  { %p2336_p3 = scmp.ne.s32.totalorder %s19_s16, %s2335_s26  ;;  %p2341_p5 = scmp.lt.s32.totalorder %s2335_s26, %s2335_s26 }
   0xd   :  { %p2342_p6 = por %p2341_p5, %p2340_p4 }
   0xf   :  { %p2343_p7 = pnand %p2342_p6, %p2336_p3 }
  0x11   :  { %2346 = shalt.err (!%p2343_p7)
}
  0x12   :  { %21 = dma.hbm_to_vmem [thread:$0]  %s2870_s0, 64, %s19_s16, [#allocation3]  }
  0x13   :  { %s2347_s5 = scalar_lea.hbm %s2871_s1, 2048 }
  0x14   :  { %p2348_p8 = scmp.ne.s32.totalorder %s2871_s1, %s2347_s5  ;;  %p2351_p9 = scmp.lt.u32.totalorder %s2347_s5, %s2871_s1 }
  0x16   :  { %p2353_p10 = pnand %p2351_p9, %p2348_p8 }
  0x18   :  { %2356 = shalt.err (!%p2353_p10)
}
  0x19   :  { %s2357_s10 = scalar_lea.vmem %s2430_s18, 2048  ;;  %p2362_p12 = scmp.lt.s32.totalorder %s2430_s18, %s2430_s18 }
  0x1a   :  { %p2358_p11 = scmp.ne.s32.totalorder %s2430_s18, %s2357_s10  ;;  %p2363_p13 = scmp.lt.s32.totalorder %s2357_s10, %s2357_s10 }
  0x1c   :  { %p2364_p0 = por %p2363_p13, %p2362_p12 }
  0x1e   :  { %p2365_p1 = pnand %p2364_p0, %p2358_p11 }
  0x20   :  { %2368 = shalt.err (!%p2365_p1)
}
  0x21   :  { %s2399_s0 = smov 128   ;;  %s2400_s11 = smov 8  }
  0x22   :  { %33 = dma.hbm_to_vmem [thread:$0]  %s2871_s1, 2048, %s2430_s18, [#allocation6], %s2399_s0, %s2399_s0, %s2400_s11  }
  0x23   :  { %2391 = dma.done.wait [#allocation3], 64  }
  0x24   :  { %2392 = vsyncadd [#allocation3], 4294967232 }
  0x25   :  { %2393 = dma.done.wait [#allocation6], 2048  }
  0x26   :  { %2394 = vsyncadd [#allocation6], 4294965248  ;;  %v2401_v0 = vmov 0.0|0.0   ;;  %vm2402_vm0 = vmmov 0   ;;  %v2403_v1 = vmov 0.0   ;;  %v45_v2 = vld [vmem:[#allocation5] sm:$0xff] }
  0x27   :  { %2006 = vmatprep.subr.bf16.mxu0 %v2401_v0  ;;  %1618 = vmatprep.mubr.msk.f32.mxu0 %vm2402_vm0, %v2403_v1  ;;  %v46_v3 = vld [vmem:[#allocation5 + $0x8] sm:$0xff]  ;;  %v47_v4 = vld [vmem:[#allocation5 + $0x10] sm:$0xff]  ;;  %v62_v5 = vand.u32 4294901760, %v45_v2  ;;  %v48_v7 = vld [vmem:[#allocation5 + $0x18] sm:$0xff]  ;;  %s2404_s17 = smov [#allocation7]  }
  0x28   :  { %2150 = vmatprep.subr.bf16.mxu1 %v2401_v0  ;;  %1828 = vmatprep.mubr.msk.f32.mxu1 %vm2402_vm0, %v2403_v1  ;;  %v65_v6 = vand.u32 4294901760, %v46_v3  ;;  %v68_v8 = vand.u32 4294901760, %v47_v4  ;;  %v71_v9 = vand.u32 4294901760, %v48_v7  ;;  %v49_v10 = vld [vmem:[#allocation5 + $0x20] sm:$0xff]  ;;  %v50_v11 = vld [vmem:[#allocation5 + $0x28] sm:$0xff]  ;;  %v51_v16 = vld [vmem:[#allocation5 + $0x30] sm:$0xff] }
  0x29   :  { %v74_v14 = vand.u32 4294901760, %v49_v10  ;;  %v77_v15 = vand.u32 4294901760, %v50_v11  ;;  %v52_v17 = vld [vmem:[#allocation5 + $0x38] sm:$0xff]  ;;  %v80_v19 = vand.u32 4294901760, %v51_v16  ;;  %v53_v21 = vld [vmem:[#allocation5 + $0x40] sm:$0xff]  ;;  %v54_v23 = vld [vmem:[#allocation5 + $0x48] sm:$0xff]  ;;  %v2489_v34 = vsub.f32 %v45_v2, %v62_v5 }
  0x2a   :  { %v2467_v12 = vpack.c.bf16 %v65_v6, %v62_v5  ;;  %v2470_v13 = vpack.c.bf16 %v71_v9, %v68_v8  ;;  %v83_v20 = vand.u32 4294901760, %v52_v17  ;;  %v2478_v22 = vld [vmem:[#allocation2] sm:$0xf]  ;;  %v55_v24 = vld [vmem:[#allocation5 + $0x50] sm:$0xff]  ;;  %v57_v26 = vld [vmem:[#allocation5 + $0x60] sm:$0xff]  ;;  %v86_v27 = vand.u32 4294901760, %v53_v21 }
  0x2b   :  { %v2476_v18 = vpack.c.bf16 %v77_v15, %v74_v14  ;;  %v56_v25 = vld [vmem:[#allocation5 + $0x58] sm:$0xff]  ;;  %v58_v28 = vld [vmem:[#allocation5 + $0x68] sm:$0xff]  ;;  %v59_v29 = vld [vmem:[#allocation5 + $0x70] sm:$0xff]  ;;  %v2484_v31 = vand.u32 4294901760, %v2478_v22  ;;  %v89_v33 = vand.u32 4294901760, %v54_v23  ;;  %v2491_v35 = vsub.f32 %v46_v3, %v65_v6  ;;  %s1370_s18 = sshll.u32 %s2404_s17, 4  ;;  %s1371_s18 = int_to_ptr.vmem [resolvable:$true] %s1370_s18 }
  0x2c   :  { %2008 = vmatpush3.bf16.msra.mxu0 %v2467_v12  ;;  %2152 = vmatpush3.bf16.msra.mxu1 %v2467_v12  ;;  %v60_v30 = vld [vmem:[#allocation5 + $0x78] sm:$0xff]  ;;  %v2487_v32 = vpack.c.bf16 %v83_v20, %v80_v19  ;;  %v92_v36 = vand.u32 4294901760, %v55_v24  ;;  %v95_v37 = vand.u32 4294901760, %v56_v25  ;;  %v98_v38 = vand.u32 4294901760, %v57_v26  ;;  %s2369_s19 = scalar_lea.vmem %s1371_s18, 64  ;;  %p2374_p3 = scmp.lt.s32.totalorder %s1371_s18, %s1371_s18 }
  0x2d   :  { %2009 = vmatprep.subr.bf16.mxu0 %v2401_v0  ;;  %2153 = vmatprep.subr.bf16.mxu1 %v2401_v0  ;;  %v101_v39 = vand.u32 4294901760, %v58_v28  ;;  %v104_v40 = vand.u32 4294901760, %v59_v29  ;;  %v107_v41 = vand.u32 4294901760, %v60_v30  ;;  %v2498_v42 = vsub.f32 %v2478_v22, %v2484_v31  ;;  %p2370_p2 = scmp.ne.s32.totalorder %s1371_s18, %s2369_s19  ;;  %p2375_p4 = scmp.lt.s32.totalorder %s2369_s19, %s2369_s19 }
  0x2e   :  { %v2500_v43 = vsub.f32 %v47_v4, %v68_v8  ;;  %v2503_v44 = vpack.c.bf16 %v89_v33, %v86_v27  ;;  %v155_v45 = vand.u32 4294901760, %v2489_v34  ;;  %v162_v46 = vand.u32 4294901760, %v2491_v35 }
  0x2f   :  { %v2507_v47 = vsub.f32 %v48_v7, %v71_v9  ;;  %v2511_v48 = vsub.f32 %v49_v10, %v74_v14  ;;  %v2514_v49 = vpack.c.bf16 %v95_v37, %v92_v36  ;;  %v2516_v50 = vpack.c.bf16 %v101_v39, %v98_v38  ;;  %p2376_p5 = por %p2375_p4, %p2374_p3 }
  0x30   :  { %2011 = vmatpush3.bf16.msra.mxu0 %v2470_v13  ;;  %2155 = vmatpush3.bf16.msra.mxu1 %v2470_v13  ;;  %v2518_v51 = vpack.c.bf16 %v107_v41, %v104_v40  ;;  %v144_v52 = vand.u32 4294901760, %v2498_v42  ;;  %v169_v53 = vand.u32 4294901760, %v2500_v43  ;;  %v2522_v54 = vsub.f32 %v50_v11, %v77_v15 }
  0x31   :  { %2012 = vmatprep.subr.bf16.mxu0 %v2401_v0  ;;  %2156 = vmatprep.subr.bf16.mxu1 %v2401_v0  ;;  %v2524_v55 = vsub.f32 %v51_v16, %v80_v19  ;;  %v156_v56 = vsub.f32 %v2489_v34, %v155_v45  ;;  %v163_v57 = vsub.f32 %v2491_v35, %v162_v46  ;;  %v176_v58 = vand.u32 4294901760, %v2507_v47  ;;  %p2377_p6 = pnand %p2376_p5, %p2370_p2 }
  0x32   :  { %v2530_v59 = vsub.f32 %v52_v17, %v83_v20  ;;  %v183_v60 = vand.u32 4294901760, %v2511_v48  ;;  %v2535_v61 = vsub.f32 %v53_v21, %v86_v27  ;;  %v2537_v62 = vsub.f32 %v54_v23, %v89_v33 }
  0x33   :  { %v2539_v63 = vsub.f32 %v55_v24, %v92_v36  ;;  %v2542_v2 = vsub.f32 %v56_v25, %v95_v37  ;;  %v2544_v3 = vsub.f32 %v57_v26, %v98_v38  ;;  %v2546_v4 = vsub.f32 %v58_v28, %v101_v39 }
  0x34   :  { %2014 = vmatpush3.bf16.msra.mxu0 %v2476_v18  ;;  %2158 = vmatpush3.bf16.msra.mxu1 %v2476_v18  ;;  %v2548_v5 = vsub.f32 %v59_v29, %v104_v40  ;;  %v145_v6 = vsub.f32 %v2498_v42, %v144_v52  ;;  %v170_v7 = vsub.f32 %v2500_v43, %v169_v53  ;;  %v190_v8 = vand.u32 4294901760, %v2522_v54 }
  0x35   :  { %2015 = vmatprep.subr.bf16.mxu0 %v2401_v0  ;;  %2159 = vmatprep.subr.bf16.mxu1 %v2401_v0  ;;  %v2555_v9 = vsub.f32 %v60_v30, %v107_v41  ;;  %v157_v10 = vand.u32 4294901760, %v156_v56  ;;  %v164_v11 = vand.u32 4294901760, %v163_v57  ;;  %v177_v14 = vsub.f32 %v2507_v47, %v176_v58 }
  0x36   :  { %v197_v15 = vand.u32 4294901760, %v2524_v55  ;;  %v204_v16 = vand.u32 4294901760, %v2530_v59  ;;  %v211_v17 = vand.u32 4294901760, %v2535_v61  ;;  %v218_v19 = vand.u32 4294901760, %v2537_v62 }
  0x37   :  { %v225_v20 = vand.u32 4294901760, %v2539_v63  ;;  %v232_v21 = vand.u32 4294901760, %v2542_v2  ;;  %v239_v23 = vand.u32 4294901760, %v2544_v3  ;;  %v246_v24 = vand.u32 4294901760, %v2546_v4 }
  0x38   :  { %2017 = vmatpush3.bf16.msra.mxu0 %v2487_v32  ;;  %2161 = vmatpush3.bf16.msra.mxu1 %v2487_v32  ;;  %v253_v25 = vand.u32 4294901760, %v2548_v5  ;;  %v260_v26 = vand.u32 4294901760, %v2555_v9  ;;  %v2572_v27 = vpack.c.bf16 %v162_v46, %v155_v45  ;;  %v2574_v28 = vpack.c.bf16 %v176_v58, %v169_v53 }
  0x39   :  { %2018 = vmatprep.subr.bf16.mxu0 %v2401_v0  ;;  %2162 = vmatprep.subr.bf16.mxu1 %v2401_v0  ;;  %v2576_v29 = vpack.c.bf16 %v190_v8, %v183_v60  ;;  %v2579_v30 = vpack.c.bf16 %v204_v16, %v197_v15  ;;  %v2581_v33 = vpack.c.bf16 %v218_v19, %v211_v17  ;;  %v146_v39 = vand.u32 4294901760, %v145_v6 }
  0x3a   :  { %v2583_v36 = vpack.c.bf16 %v232_v21, %v225_v20  ;;  %v2585_v37 = vpack.c.bf16 %v246_v24, %v239_v23  ;;  %v2588_v38 = vpack.c.bf16 %v260_v26, %v253_v25  ;;  %v184_v40 = vsub.f32 %v2511_v48, %v183_v60 }
  0x3b   :  { %v2594_v41 = vpack.c.bf16 %v164_v11, %v157_v10  ;;  %v171_v45 = vand.u32 4294901760, %v170_v7  ;;  %v178_v46 = vand.u32 4294901760, %v177_v14  ;;  %v191_v53 = vsub.f32 %v2522_v54, %v190_v8 }
  0x3c   :  { %2020 = vmatpush3.bf16.msra.mxu0 %v2503_v44  ;;  %2164 = vmatpush3.bf16.msra.mxu1 %v2503_v44  ;;  %v198_v56 = vsub.f32 %v2524_v55, %v197_v15  ;;  %v185_v58 = vand.u32 4294901760, %v184_v40  ;;  %v205_v6 = vsub.f32 %v2530_v59, %v204_v16  ;;  %v212_v11 = vsub.f32 %v2535_v61, %v211_v17 }
  0x3d   :  { %2021 = vmatprep.subr.bf16.mxu0 %v2401_v0  ;;  %2165 = vmatprep.subr.bf16.mxu1 %v2401_v0  ;;  %v2602_v57 = vpack.c.bf16 %v178_v46, %v171_v45  ;;  %v192_v60 = vand.u32 4294901760, %v191_v53  ;;  %v219_v14 = vsub.f32 %v2537_v62, %v218_v19  ;;  %v226_v15 = vsub.f32 %v2539_v63, %v225_v20 }
  0x3e   :  { %v199_v7 = vand.u32 4294901760, %v198_v56  ;;  %v206_v10 = vand.u32 4294901760, %v205_v6  ;;  %v233_v45 = vsub.f32 %v2542_v2, %v232_v21  ;;  %v240_v46 = vsub.f32 %v2544_v3, %v239_v23 }
  0x3f   :  { %v2609_v8 = vpack.c.bf16 %v192_v60, %v185_v58  ;;  %v220_v40 = vand.u32 4294901760, %v219_v14  ;;  %v227_v19 = vand.u32 4294901760, %v226_v15  ;;  %v247_v20 = vsub.f32 %v2546_v4, %v246_v24 }
  0x40   :  { %2023 = vmatpush3.bf16.msra.mxu0 %v2514_v49  ;;  %2167 = vmatpush3.bf16.msra.mxu1 %v2514_v49  ;;  %v2616_v16 = vpack.c.bf16 %v206_v10, %v199_v7  ;;  %v234_v53 = vand.u32 4294901760, %v233_v45  ;;  %v254_v56 = vsub.f32 %v2548_v5, %v253_v25  ;;  %v241_v21 = vand.u32 4294901760, %v240_v46 }
  0x41   :  { %2024 = vmatprep.subr.bf16.mxu0 %v2401_v0  ;;  %2168 = vmatprep.subr.bf16.mxu1 %v2401_v0  ;;  %v248_v60 = vand.u32 4294901760, %v247_v20  ;;  %v261_v23 = vsub.f32 %v2555_v9, %v260_v26  ;;  %v2643_v26 = vpack.c.bf16 %v2491_v35, %v2489_v34  ;;  %v2650_v10 = vpack.c.bf16 %v2507_v47, %v2500_v43 }
  0x42   :  { %v2628_v58 = vpack.c.bf16 %v234_v53, %v227_v19  ;;  %v255_v7 = vand.u32 4294901760, %v254_v56  ;;  %v2658_v34 = vpack.c.bf16 %v2522_v54, %v2511_v48  ;;  %v2664_v35 = vpack.c.bf16 %v2530_v59, %v2524_v55 }
  0x43   :  { %v2633_v6 = vpack.c.bf16 %v248_v60, %v241_v21  ;;  %v262_v24 = vand.u32 4294901760, %v261_v23  ;;  %v2670_v43 = vpack.c.bf16 %v2537_v62, %v2535_v61  ;;  %v2676_v47 = vpack.c.bf16 %v2542_v2, %v2539_v63 }
  0x44   :  { %2026 = vmatpush3.bf16.msra.mxu0 %v2516_v50  ;;  %2170 = vmatpush3.bf16.msra.mxu1 %v2516_v50  ;;  %v2682_v48 = vpack.c.bf16 %v2546_v4, %v2544_v3  ;;  %v2688_v54 = vpack.c.bf16 %v2555_v9, %v2548_v5 }
  0x45   :  { %2027 = vmatprep.subr.bf16.mxu0 %v2401_v0  ;;  %2171 = vmatprep.subr.bf16.mxu1 %v2401_v0  ;;  %v2637_v25 = vpack.c.bf16 %v262_v24, %v255_v7 }
  0x48   :  { %2029 = vmatpush3.bf16.msra.mxu0 %v2518_v51  ;;  %2173 = vmatpush3.bf16.msra.mxu1 %v2518_v51 }
  0x49   :  { %2030 = vmatprep.subr.bf16.mxu0 %v2401_v0  ;;  %2174 = vmatprep.subr.bf16.mxu1 %v2401_v0 }
  0x4b   :  { %1619 = vmatmul.mubr.f32.vlgmr.msra.gmra.mrb[0].mxu0 %v146_v39  ;;  %v213_v39 = vand.u32 4294901760, %v212_v11 }
  0x4c   :  { %2032 = vmatpush3.bf16.msra.mxu0 %v2594_v41  ;;  %1653 = vmatprep.mubr.msk.f32.mxu0 %vm2402_vm0, %v2403_v1 }
  0x4d   :  { %2033 = vmatprep.subr.bf16.mxu0 %v2401_v0  ;;  %v2622_v17 = vpack.c.bf16 %v220_v40, %v213_v39 }
  0x50   :  { %2035 = vmatpush3.bf16.msra.mxu0 %v2602_v57 }
  0x51   :  { %2036 = vmatprep.subr.bf16.mxu0 %v2401_v0 }
  0x54   :  { %2038 = vmatpush3.bf16.msra.mxu0 %v2609_v8 }
  0x55   :  { %2039 = vmatprep.subr.bf16.mxu0 %v2401_v0 }
  0x58   :  { %2041 = vmatpush3.bf16.msra.mxu0 %v2616_v16 }
  0x59   :  { %2042 = vmatprep.subr.bf16.mxu0 %v2401_v0 }
  0x5c   :  { %2044 = vmatpush3.bf16.msra.mxu0 %v2622_v17 }
  0x5d   :  { %2045 = vmatprep.subr.bf16.mxu0 %v2401_v0 }
  0x60   :  { %2047 = vmatpush3.bf16.msra.mxu0 %v2628_v58 }
  0x61   :  { %2048 = vmatprep.subr.bf16.mxu0 %v2401_v0 }
  0x64   :  { %2050 = vmatpush3.bf16.msra.mxu0 %v2633_v6 }
  0x65   :  { %2051 = vmatprep.subr.bf16.mxu0 %v2401_v0 }
  0x68   :  { %2053 = vmatpush3.bf16.msra.mxu0 %v2637_v25 }
  0x69   :  { %2054 = vmatprep.subr.bf16.mxu0 %v2401_v0 }
  0x6b   :  { %1654 = vmatmul.mubr.f32.vlgmr.msra.gmra.mrb[0].mxu0 %v2484_v31 }
  0x6c   :  { %2056 = vmatpush3.bf16.msra.mxu0 %v2643_v26  ;;  %1688 = vmatprep.mubr.msk.f32.mxu0 %vm2402_vm0, %v2403_v1 }
  0x6d   :  { %2057 = vmatprep.subr.bf16.mxu0 %v2401_v0 }
  0x70   :  { %2059 = vmatpush3.bf16.msra.mxu0 %v2650_v10 }
  0x71   :  { %2060 = vmatprep.subr.bf16.mxu0 %v2401_v0 }
  0x74   :  { %2062 = vmatpush3.bf16.msra.mxu0 %v2658_v34 }
  0x75   :  { %2063 = vmatprep.subr.bf16.mxu0 %v2401_v0 }
  0x78   :  { %2065 = vmatpush3.bf16.msra.mxu0 %v2664_v35 }
  0x79   :  { %2066 = vmatprep.subr.bf16.mxu0 %v2401_v0 }
  0x7c   :  { %2068 = vmatpush3.bf16.msra.mxu0 %v2670_v43 }
  0x7d   :  { %2069 = vmatprep.subr.bf16.mxu0 %v2401_v0 }
  0x80   :  { %2071 = vmatpush3.bf16.msra.mxu0 %v2676_v47 }
  0x81   :  { %2072 = vmatprep.subr.bf16.mxu0 %v2401_v0 }
  0x84   :  { %2074 = vmatpush3.bf16.msra.mxu0 %v2682_v48 }
  0x85   :  { %2075 = vmatprep.subr.bf16.mxu0 %v2401_v0 }
  0x88   :  { %2077 = vmatpush3.bf16.msra.mxu0 %v2688_v54 }
  0x89   :  { %2078 = vmatprep.subr.bf16.mxu0 %v2401_v0 }
  0x8b   :  { %1689 = vmatmul.mubr.f32.vlgmr.msra.gmra.mrb[0].mxu0 %v2498_v42 }
  0x8c   :  { %2080 = vmatpush3.bf16.msra.mxu0 %v2467_v12  ;;  %1723 = vmatprep.mubr.msk.f32.mxu0 %vm2402_vm0, %v2403_v1 }
  0x8d   :  { %2081 = vmatprep.subr.bf16.mxu0 %v2401_v0 }
  0x90   :  { %2083 = vmatpush3.bf16.msra.mxu0 %v2470_v13 }
  0x91   :  { %2084 = vmatprep.subr.bf16.mxu0 %v2401_v0 }
  0x94   :  { %2086 = vmatpush3.bf16.msra.mxu0 %v2476_v18 }
  0x95   :  { %2087 = vmatprep.subr.bf16.mxu0 %v2401_v0 }
  0x98   :  { %2089 = vmatpush3.bf16.msra.mxu0 %v2487_v32 }
  0x99   :  { %2090 = vmatprep.subr.bf16.mxu0 %v2401_v0 }
  0x9c   :  { %2092 = vmatpush3.bf16.msra.mxu0 %v2503_v44 }
  0x9d   :  { %2093 = vmatprep.subr.bf16.mxu0 %v2401_v0 }
  0xa0   :  { %2095 = vmatpush3.bf16.msra.mxu0 %v2514_v49 }
  0xa1   :  { %2096 = vmatprep.subr.bf16.mxu0 %v2401_v0 }
  0xa4   :  { %2098 = vmatpush3.bf16.msra.mxu0 %v2516_v50 }
  0xa5   :  { %2099 = vmatprep.subr.bf16.mxu0 %v2401_v0 }
  0xa8   :  { %2101 = vmatpush3.bf16.msra.mxu0 %v2518_v51 }
  0xa9   :  { %2102 = vmatprep.subr.bf16.mxu0 %v2401_v0 }
  0xab   :  { %1724 = vmatmul.mubr.f32.vlgmr.msra.gmra.mrb[0].mxu0 %v144_v52 }
  0xac   :  { %2104 = vmatpush3.bf16.msra.mxu0 %v2572_v27  ;;  %1758 = vmatprep.mubr.msk.f32.mxu0 %vm2402_vm0, %v2403_v1 }
  0xad   :  { %2105 = vmatprep.subr.bf16.mxu0 %v2401_v0 }
  0xb0   :  { %2107 = vmatpush3.bf16.msra.mxu0 %v2574_v28 }
  0xb1   :  { %2108 = vmatprep.subr.bf16.mxu0 %v2401_v0 }
  0xb4   :  { %2110 = vmatpush3.bf16.msra.mxu0 %v2576_v29 }
  0xb5   :  { %2111 = vmatprep.subr.bf16.mxu0 %v2401_v0 }
  0xb8   :  { %2113 = vmatpush3.bf16.msra.mxu0 %v2579_v30 }
  0xb9   :  { %2114 = vmatprep.subr.bf16.mxu0 %v2401_v0 }
  0xbc   :  { %2116 = vmatpush3.bf16.msra.mxu0 %v2581_v33 }
  0xbd   :  { %2117 = vmatprep.subr.bf16.mxu0 %v2401_v0 }
  0xc0   :  { %2119 = vmatpush3.bf16.msra.mxu0 %v2583_v36 }
  0xc1   :  { %2120 = vmatprep.subr.bf16.mxu0 %v2401_v0 }
  0xc4   :  { %2122 = vmatpush3.bf16.msra.mxu0 %v2585_v37 }
  0xc5   :  { %2123 = vmatprep.subr.bf16.mxu0 %v2401_v0 }
  0xc8   :  { %2125 = vmatpush3.bf16.msra.mxu0 %v2588_v38 }
  0xc9   :  { %2126 = vmatprep.subr.bf16.mxu0 %v2401_v0 }
  0xcb   :  { %1759 = vmatmul.mubr.f32.vlgmr.msra.gmra.mrb[0].mxu0 %v2484_v31 }
  0xcc   :  { %2128 = vmatpush3.bf16.msra.mxu0 %v2467_v12  ;;  %1793 = vmatprep.mubr.msk.f32.mxu0 %vm2402_vm0, %v2403_v1 }
  0xcd   :  { %2129 = vmatprep.subr.bf16.mxu0 %v2401_v0 }
  0xd0   :  { %2131 = vmatpush3.bf16.msra.mxu0 %v2470_v13 }
  0xd1   :  { %2132 = vmatprep.subr.bf16.mxu0 %v2401_v0 }
  0xd4   :  { %2134 = vmatpush3.bf16.msra.mxu0 %v2476_v18 }
  0xd5   :  { %2135 = vmatprep.subr.bf16.mxu0 %v2401_v0 }
  0xd8   :  { %2137 = vmatpush3.bf16.msra.mxu0 %v2487_v32 }
  0xd9   :  { %2138 = vmatprep.subr.bf16.mxu0 %v2401_v0 }
  0xdc   :  { %2140 = vmatpush3.bf16.msra.mxu0 %v2503_v44 }
  0xdd   :  { %2141 = vmatprep.subr.bf16.mxu0 %v2401_v0 }
  0xe0   :  { %2143 = vmatpush3.bf16.msra.mxu0 %v2514_v49 }
  0xe1   :  { %2144 = vmatprep.subr.bf16.mxu0 %v2401_v0 }
  0xe4   :  { %2146 = vmatpush3.bf16.msra.mxu0 %v2516_v50 }
  0xe5   :  { %2147 = vmatprep.subr.bf16.mxu0 %v2401_v0 }
  0xe8   :  { %2149 = vmatpush3.bf16.msra.mxu0 %v2518_v51 }
  0xeb   :  { %1794 = vmatmul.mubr.f32.vlgmr.msra.gmra.mrb[0].mxu0 %v2484_v31 }
 0x1be   :  { %v698_v42 = vpop.f32.mrb[0].mxu0 }
 0x1bf   :  { %v2752_v52 = vsub.f32 %v2478_v22, %v698_v42  ;;  %v1795_v55 = vpop.f32.mrb[1].mxu0  ;;  %v1380_v22 = vld [vmem:[%s2872_s2] ss:$0 sm:$0xff] }
 0x1c1   :  { %v703_v59 = vmul.f32 %v2752_v52, %v2752_v52 }
 0x1c3   :  { %v2756_v61 = vand.u32 4294901760, %v703_v59 }
 0x1c5   :  { %v786_v62 = vsub.f32 %v703_v59, %v2756_v61 }
 0x1c7   :  { %v787_v63 = vand.u32 4294901760, %v786_v62 }
 0x1c9   :  { %v788_v2 = vsub.f32 %v786_v62, %v787_v63 }
 0x1cb   :  { %v789_v3 = vand.u32 4294901760, %v788_v2 }
 0x1cd   :  { %1829 = vmatmul.mubr.f32.vlgmr.msra.gmra.mrb[0].mxu1 %v789_v3 }
 0x1ce   :  { %2176 = vmatpush3.bf16.msra.mxu1 %v2594_v41  ;;  %1863 = vmatprep.mubr.msk.f32.mxu1 %vm2402_vm0, %v2403_v1 }
 0x1cf   :  { %2177 = vmatprep.subr.bf16.mxu1 %v2401_v0 }
 0x1d2   :  { %2179 = vmatpush3.bf16.msra.mxu1 %v2602_v57 }
 0x1d3   :  { %2180 = vmatprep.subr.bf16.mxu1 %v2401_v0 }
 0x1d6   :  { %2182 = vmatpush3.bf16.msra.mxu1 %v2609_v8 }
 0x1d7   :  { %2183 = vmatprep.subr.bf16.mxu1 %v2401_v0 }
 0x1da   :  { %2185 = vmatpush3.bf16.msra.mxu1 %v2616_v16 }
 0x1db   :  { %2186 = vmatprep.subr.bf16.mxu1 %v2401_v0 }
 0x1de   :  { %2188 = vmatpush3.bf16.msra.mxu1 %v2622_v17 }
 0x1df   :  { %2189 = vmatprep.subr.bf16.mxu1 %v2401_v0 }
 0x1e2   :  { %2191 = vmatpush3.bf16.msra.mxu1 %v2628_v58 }
 0x1e3   :  { %2192 = vmatprep.subr.bf16.mxu1 %v2401_v0 }
 0x1e6   :  { %2194 = vmatpush3.bf16.msra.mxu1 %v2633_v6 }
 0x1e7   :  { %2195 = vmatprep.subr.bf16.mxu1 %v2401_v0 }
 0x1ea   :  { %2197 = vmatpush3.bf16.msra.mxu1 %v2637_v25 }
 0x1eb   :  { %2198 = vmatprep.subr.bf16.mxu1 %v2401_v0 }
 0x1ed   :  { %1864 = vmatmul.mubr.f32.vlgmr.msra.gmra.mrb[0].mxu1 %v2756_v61 }
 0x1ee   :  { %2200 = vmatpush3.bf16.msra.mxu1 %v2643_v26  ;;  %1898 = vmatprep.mubr.msk.f32.mxu1 %vm2402_vm0, %v2403_v1 }
 0x1ef   :  { %2201 = vmatprep.subr.bf16.mxu1 %v2401_v0 }
 0x1f2   :  { %2203 = vmatpush3.bf16.msra.mxu1 %v2650_v10 }
 0x1f3   :  { %2204 = vmatprep.subr.bf16.mxu1 %v2401_v0 }
 0x1f6   :  { %2206 = vmatpush3.bf16.msra.mxu1 %v2658_v34 }
 0x1f7   :  { %2207 = vmatprep.subr.bf16.mxu1 %v2401_v0 }
 0x1fa   :  { %2209 = vmatpush3.bf16.msra.mxu1 %v2664_v35 }
 0x1fb   :  { %2210 = vmatprep.subr.bf16.mxu1 %v2401_v0 }
 0x1fe   :  { %2212 = vmatpush3.bf16.msra.mxu1 %v2670_v43 }
 0x1ff   :  { %2213 = vmatprep.subr.bf16.mxu1 %v2401_v0 }
 0x202   :  { %2215 = vmatpush3.bf16.msra.mxu1 %v2676_v47 }
 0x203   :  { %2216 = vmatprep.subr.bf16.mxu1 %v2401_v0 }
 0x206   :  { %2218 = vmatpush3.bf16.msra.mxu1 %v2682_v48 }
 0x207   :  { %2219 = vmatprep.subr.bf16.mxu1 %v2401_v0 }
 0x20a   :  { %2221 = vmatpush3.bf16.msra.mxu1 %v2688_v54 }
 0x20b   :  { %2222 = vmatprep.subr.bf16.mxu1 %v2401_v0 }
 0x20d   :  { %1899 = vmatmul.mubr.f32.vlgmr.msra.gmra.mrb[0].mxu1 %v786_v62 }
 0x20e   :  { %2224 = vmatpush3.bf16.msra.mxu1 %v2467_v12  ;;  %1933 = vmatprep.mubr.msk.f32.mxu1 %vm2402_vm0, %v2403_v1 }
 0x20f   :  { %2225 = vmatprep.subr.bf16.mxu1 %v2401_v0 }
 0x212   :  { %2227 = vmatpush3.bf16.msra.mxu1 %v2470_v13 }
 0x213   :  { %2228 = vmatprep.subr.bf16.mxu1 %v2401_v0 }
 0x216   :  { %2230 = vmatpush3.bf16.msra.mxu1 %v2476_v18 }
 0x217   :  { %2231 = vmatprep.subr.bf16.mxu1 %v2401_v0 }
 0x21a   :  { %2233 = vmatpush3.bf16.msra.mxu1 %v2487_v32 }
 0x21b   :  { %2234 = vmatprep.subr.bf16.mxu1 %v2401_v0 }
 0x21e   :  { %2236 = vmatpush3.bf16.msra.mxu1 %v2503_v44 }
 0x21f   :  { %2237 = vmatprep.subr.bf16.mxu1 %v2401_v0 }
 0x222   :  { %2239 = vmatpush3.bf16.msra.mxu1 %v2514_v49 }
 0x223   :  { %2240 = vmatprep.subr.bf16.mxu1 %v2401_v0 }
 0x226   :  { %2242 = vmatpush3.bf16.msra.mxu1 %v2516_v50 }
 0x227   :  { %2243 = vmatprep.subr.bf16.mxu1 %v2401_v0 }
 0x22a   :  { %2245 = vmatpush3.bf16.msra.mxu1 %v2518_v51 }
 0x22b   :  { %2246 = vmatprep.subr.bf16.mxu1 %v2401_v0 }
 0x22d   :  { %1934 = vmatmul.mubr.f32.vlgmr.msra.gmra.mrb[0].mxu1 %v787_v63 }
 0x22e   :  { %2248 = vmatpush3.bf16.msra.mxu1 %v2572_v27  ;;  %1968 = vmatprep.mubr.msk.f32.mxu1 %vm2402_vm0, %v2403_v1 }
 0x22f   :  { %2249 = vmatprep.subr.bf16.mxu1 %v2401_v0 }
 0x232   :  { %2251 = vmatpush3.bf16.msra.mxu1 %v2574_v28 }
 0x233   :  { %2252 = vmatprep.subr.bf16.mxu1 %v2401_v0 }
 0x236   :  { %2254 = vmatpush3.bf16.msra.mxu1 %v2576_v29 }
 0x237   :  { %2255 = vmatprep.subr.bf16.mxu1 %v2401_v0 }
 0x23a   :  { %2257 = vmatpush3.bf16.msra.mxu1 %v2579_v30 }
 0x23b   :  { %2258 = vmatprep.subr.bf16.mxu1 %v2401_v0 }
 0x23e   :  { %2260 = vmatpush3.bf16.msra.mxu1 %v2581_v33 }
 0x23f   :  { %2261 = vmatprep.subr.bf16.mxu1 %v2401_v0 }
 0x242   :  { %2263 = vmatpush3.bf16.msra.mxu1 %v2583_v36 }
 0x243   :  { %2264 = vmatprep.subr.bf16.mxu1 %v2401_v0 }
 0x246   :  { %2266 = vmatpush3.bf16.msra.mxu1 %v2585_v37 }
 0x247   :  { %2267 = vmatprep.subr.bf16.mxu1 %v2401_v0 }
 0x24a   :  { %2269 = vmatpush3.bf16.msra.mxu1 %v2588_v38 }
 0x24b   :  { %2270 = vmatprep.subr.bf16.mxu1 %v2401_v0 }
 0x24d   :  { %1969 = vmatmul.mubr.f32.vlgmr.msra.gmra.mrb[0].mxu1 %v2756_v61 }
 0x24e   :  { %2272 = vmatpush3.bf16.msra.mxu1 %v2467_v12  ;;  %2003 = vmatprep.mubr.msk.f32.mxu1 %vm2402_vm0, %v2403_v1 }
 0x24f   :  { %2273 = vmatprep.subr.bf16.mxu1 %v2401_v0 }
 0x252   :  { %2275 = vmatpush3.bf16.msra.mxu1 %v2470_v13 }
 0x253   :  { %2276 = vmatprep.subr.bf16.mxu1 %v2401_v0 }
 0x256   :  { %2278 = vmatpush3.bf16.msra.mxu1 %v2476_v18 }
 0x257   :  { %2279 = vmatprep.subr.bf16.mxu1 %v2401_v0 }
 0x25a   :  { %2281 = vmatpush3.bf16.msra.mxu1 %v2487_v32  ;;  %v1381_v32 = vld [vmem:[%s2873_s3] ss:$0 sm:$0xff] }
 0x25b   :  { %2282 = vmatprep.subr.bf16.mxu1 %v2401_v0 }
 0x25e   :  { %2284 = vmatpush3.bf16.msra.mxu1 %v2503_v44 }
 0x25f   :  { %2285 = vmatprep.subr.bf16.mxu1 %v2401_v0 }
 0x262   :  { %2287 = vmatpush3.bf16.msra.mxu1 %v2514_v49 }
 0x263   :  { %2288 = vmatprep.subr.bf16.mxu1 %v2401_v0 }
 0x266   :  { %2290 = vmatpush3.bf16.msra.mxu1 %v2516_v50 }
 0x267   :  { %2291 = vmatprep.subr.bf16.mxu1 %v2401_v0 }
 0x26a   :  { %2293 = vmatpush3.bf16.msra.mxu1 %v2518_v51 }
 0x26d   :  { %2004 = vmatmul.mubr.f32.vlgmr.msra.gmra.mrb[0].mxu1 %v2756_v61 }
 0x340   :  { %v1341_v1 = vpop.f32.mrb[0].mxu1 }
 0x341   :  { %v2294_v12 = vadd.f32 1e-05, %v1341_v1  ;;  %v2005_v13 = vpop.f32.mrb[1].mxu1 }
 0x343   :  { %2323 = vrsqrt.f32 %v2294_v12 }
 0x34d   :  { %v2324_v18 = vpop.eup %2323 }
 0x34e   :  { %v1346_v31 = vmul.f32 %v2324_v18, %v2752_v52 }
 0x350   :  { %v1354_v0 = vmul.f32 %v1380_v22, %v1346_v31 }
 0x352   :  { %v1362_v44 = vadd.f32 %v1381_v32, %v1354_v0 }
 0x354   :  { %1363 = vst [vmem:[#allocation7] sm:$0xf] %v1362_v44 }
 0x355   :  { %2380 = shalt.err (!%p2377_p6)
}
 0x356   :  { %s2381_s21 = scalar_lea.hbm %s2874_s4, 64 }
 0x357   :  { %p2382_p7 = scmp.ne.s32.totalorder %s2874_s4, %s2381_s21  ;;  %p2385_p8 = scmp.lt.u32.totalorder %s2381_s21, %s2874_s4 }
 0x359   :  { %p2387_p9 = pnand %p2385_p8, %p2382_p7 }
 0x35b   :  { %2390 = shalt.err (!%p2387_p9)
}
 0x35c   :  { %1373 = dma.vmem_to_hbm [thread:$0]  %s1371_s18, 64, %s2874_s4, [#allocation4]  }
 0x35d   :  { %2395 = dma.done.wait [#allocation4], 64  }
 0x35e   :  { %2396 = vsyncadd [#allocation4], 4294967232 }
 0x35f   :  { %1377 = vsyncpa [#allocation3], 1 }
 0x360   :  { %1378 = vsyncpa [#allocation6], 1 }
 0x361   :  { %1379 = vsyncpa [#allocation4], 1 }

</bundles_post_ra>
